<compile_context>
chip_gen: v7x
topology: tpu7x:2x2x1
jax: 0.10.0
libtpu: 0.0.40
codegen_flags: <defaults>
</compile_context>

<pallas_src>
import functools

import jax
import jax.numpy as jnp
from jax.experimental import pallas as pl
from jax.experimental.pallas import tpu as pltpu


# ----------------------------------------------------------------------------
# Kernel: one invocation, whole-array VMEM blocks, 4 small matmuls total.
# ----------------------------------------------------------------------------
def _sym_fc_kernel(x_ref,                # (B, 64)        flattened feature
                   w1_ref, b1_ref,       # (64, H*32), (1, H*32)   head-concat
                   w2_ref, b2_ref,       # (H*32, H*16), (1, H*16) block-diag
                   w3_ref, b3_ref,       # (H*16, H*4), (1, H*4)   block-diag
                   seg_ref,              # (H*4, H*4) masked segment-sum matrix
                   o_ref):               # (B, H*4)   lane-dense output

    def leaky(v):
        return jnp.where(v >= 0, v, 0.2 * v)

    x = x_ref[...]                                                   # (B, 64)
    h1 = leaky(jnp.dot(x, w1_ref[...],
                       preferred_element_type=jnp.float32) + b1_ref[...])
    h2 = leaky(jnp.dot(h1, w2_ref[...],
                       preferred_element_type=jnp.float32) + b2_ref[...])
    h3 = leaky(jnp.dot(h2, w3_ref[...],
                       preferred_element_type=jnp.float32) + b3_ref[...])

    # Per-head masked L2 norm via segment-sum matmul:
    #   sumsq[b, j] = sum_i h3[b, i]^2 * seg[i, j]
    # seg already encodes both "same head" and "lane < ndims[head]".
    sumsq = jnp.dot(h3 * h3, seg_ref[...],
                    preferred_element_type=jnp.float32)              # (B, H*4)
    # TODO(synk): no eps guard (matches PRS_Net's normalize, which divides by
    # the raw norm); add jnp.maximum(sumsq, eps) if the reference helper does.
    inv = jax.lax.rsqrt(sumsq)                                       # EUP
    o_ref[...] = h3 * inv


# ----------------------------------------------------------------------------
# Host-side weight packing (done once, outside the per-call path).
# ----------------------------------------------------------------------------
def _block_diag(w):
    """(H, r, c) -> (H*r, H*c) block-diagonal."""
    H, r, c = w.shape
    out = jnp.zeros((H * r, H * c), w.dtype)
    for h in range(H):
        out = out.at[h * r:(h + 1) * r, h * c:(h + 1) * c].set(w[h])
    return out


def pack_sym_fc_params(ndims, W1, b1, W2, b2, W3, b3):
    """Pre-pack stacked per-head weights into fused operands.

    W1: (H,64,32)  b1: (H,1,32)
    W2: (H,32,16)  b2: (H,1,16)
    W3: (H,16, 4)  b3: (H,1, 4)
    ndims: (H,) int32 -- 4 for quat heads, 3 for plane heads.
    """
    H = W1.shape[0]
    W1p = jnp.transpose(W1, (1, 0, 2)).reshape(64, H * 32)
    b1p = b1.reshape(1, H * 32)
    W2p = _block_diag(W2)                       # (H*32, H*16)
    b2p = b2.reshape(1, H * 16)
    W3p = _block_diag(W3)                       # (H*16, H*4)
    b3p = b3.reshape(1, H * 4)

    # seg[i, j] = 1 if head(i) == head(j) and lane(i) < ndims[head(i)] else 0
    HD = H * 4
    idx = jnp.arange(HD)
    head = idx // 4
    lane = idx % 4
    in_dim = lane < jnp.asarray(ndims)[head]                        # (HD,)
    same_head = head[:, None] == head[None, :]                      # (HD, HD)
    seg = (same_head & in_dim[:, None]).astype(jnp.float32)
    return W1p, b1p, W2p, b2p, W3p, b3p, seg


# ----------------------------------------------------------------------------
# Pallas wrapper.
# ----------------------------------------------------------------------------
@jax.jit
def sym_fc_pallas_packed(feature, W1p, b1p, W2p, b2p, W3p, b3p, seg):
    B = feature.shape[0]
    x = feature.reshape(B, -1).astype(jnp.float32)                  # (B, 64)
    H4 = W3p.shape[1]
    H = H4 // 4

    vmem = pl.BlockSpec(memory_space=pltpu.MemorySpace.VMEM)
    out = pl.pallas_call(
        _sym_fc_kernel,
        out_shape=jax.ShapeDtypeStruct((B, H4), jnp.float32),
        in_specs=[vmem] * 8,
        out_specs=vmem,
    )(x, W1p, b1p, W2p, b2p, W3p, b3p, seg)                         # (B, H*4)

    # Lane-dense output -> (H, B, 4) layout the module's (quat, plane) lists use.
    return jnp.transpose(out.reshape(B, H, 4), (1, 0, 2))


def sym_fc_pallas(feature, ndims, W1, b1, W2, b2, W3, b3):
    """Convenience wrapper: pack + run (packing is cheap; pack once if reusing)."""
    packed = pack_sym_fc_params(ndims, W1, b1, W2, b2, W3, b3)
    return sym_fc_pallas_packed(feature, *packed)


# ----------------------------------------------------------------------------
# Pure-JAX reference (mirrors the PyTorch forward) for verification.
# ----------------------------------------------------------------------------
def _ref_forward(feature, ndims, W1, b1, W2, b2, W3, b3):
    B = feature.shape[0]
    x = feature.reshape(B, -1).astype(jnp.float32)
    leaky = lambda v: jnp.where(v >= 0, v, 0.2 * v)
    outs = []
    for h in range(W1.shape[0]):
        y = leaky(x @ W1[h] + b1[h, 0])
        y = leaky(y @ W2[h] + b2[h, 0])
        y = leaky(y @ W3[h] + b3[h, 0])
        d = int(ndims[h])
        y = y / jnp.linalg.norm(y[:, :d], axis=1, keepdims=True)
        outs.append(y)
    return jnp.stack(outs, axis=0)


def _init_params(key, num_quat, num_plane, bias_terms):
    """Deterministic synthetic init (PyTorch-Linear-style uniform fan-in)."""
    H = num_quat + num_plane
    ks = jax.random.split(key, 6)

    def uni(k, shape, fan_in):
        bound = 1.0 / jnp.sqrt(fan_in)
        return jax.random.uniform(k, shape, jnp.float32, -bound, bound)

    W1 = uni(ks[0], (H, 64, 32), 64)
    b1 = uni(ks[1], (H, 1, 32), 64)
    W2 = uni(ks[2], (H, 32, 16), 32)
    b2 = uni(ks[3], (H, 1, 16), 32)
    W3 = uni(ks[4], (H, 16, 4), 16)
    # last-layer bias set from biasTerms (quat heads first, then plane heads)
    last_bias = []
    for i in range(num_quat):
        last_bias.append(bias_terms['quat' + str(i + 1)])
    for i in range(num_plane):
        last_bias.append(bias_terms['plane' + str(i + 1)])
    b3 = jnp.asarray(last_bias, jnp.float32).reshape(H, 1, 4)
    return W1, b1, W2, b2, W3, b3


if __name__ == "__main__":
    num_quat, num_plane = 3, 3
    bias_terms = {
        'plane1': [1.0, 0.0, 0.0, 0.0],
        'plane2': [0.0, 1.0, 0.0, 0.0],
        'plane3': [0.0, 0.0, 1.0, 0.0],
        'quat1': [0.0, 0.0, 0.0, 1.0],
        'quat2': [0.0, 0.0, 1.0, 0.0],
        'quat3': [0.0, 1.0, 0.0, 0.0],
    }

    key = jax.random.PRNGKey(0)
    k_feat, k_par = jax.random.split(key)

    # feature: (B, C, D, H') = (2, 4, 4, 4) -> flattens to (2, 64), matching in_features=64.
    feature = jax.random.normal(k_feat, (2, 4, 4, 4), jnp.float32)

    W1, b1, W2, b2, W3, b3 = _init_params(k_par, num_quat, num_plane, bias_terms)
    # normalization dim per head: 4 for quat heads, 3 for plane heads.
    ndims = jnp.asarray([4] * num_quat + [3] * num_plane, jnp.int32)

    # Pack once (host side), then run the single fused kernel.
    packed = pack_sym_fc_params(ndims, W1, b1, W2, b2, W3, b3)
    out = sym_fc_pallas_packed(feature, *packed)
    out = jax.block_until_ready(out)                                 # (H, B, 4)

    # split into the (quat, plane) lists the PyTorch module returns
    quat = [out[i] for i in range(num_quat)]
    plane = [out[num_quat + i] for i in range(num_plane)]

    ref = _ref_forward(feature, ndims, W1, b1, W2, b2, W3, b3)
    assert jnp.allclose(out, ref, atol=1e-5, rtol=1e-4), \
        f"max err {jnp.max(jnp.abs(out - ref))}"
    assert len(quat) == num_quat and len(plane) == num_plane
    assert quat[0].shape == (2, 4) and plane[0].shape == (2, 4)

    print("KERNEL_OK")
</pallas_src>

<mosaic_0001>
module attributes {stable_mosaic.version = 11 : i64} {
  func.func @_sym_fc_kernel(%arg0: memref<2x64xf32, #tpu.memory_space<vmem>>, %arg1: memref<64x192xf32, #tpu.memory_space<vmem>>, %arg2: memref<1x192xf32, #tpu.memory_space<vmem>>, %arg3: memref<192x96xf32, #tpu.memory_space<vmem>>, %arg4: memref<1x96xf32, #tpu.memory_space<vmem>>, %arg5: memref<96x24xf32, #tpu.memory_space<vmem>>, %arg6: memref<1x24xf32, #tpu.memory_space<vmem>>, %arg7: memref<24x24xf32, #tpu.memory_space<vmem>>, %arg8: memref<2x24xf32, #tpu.memory_space<vmem>>) attributes {dimension_semantics = [], scalar_prefetch = 0 : i64, scratch_operands = 0 : i64, tpu.core_type = #tpu.core_type<tc>} {
    %c0 = arith.constant 0 : index
    %c0_0 = arith.constant 0 : index
    %0 = vector.load %arg0[%c0, %c0_0] : memref<2x64xf32, #tpu.memory_space<vmem>>, vector<2x64xf32>
    %c0_1 = arith.constant 0 : index
    %c0_2 = arith.constant 0 : index
    %1 = vector.load %arg1[%c0_1, %c0_2] : memref<64x192xf32, #tpu.memory_space<vmem>>, vector<64x192xf32>
    %cst = arith.constant dense<0.000000e+00> : vector<2x192xf32>
    %2 = tpu.matmul %0, %1, %cst {dimension_numbers = #tpu.dot_dimension_numbers<[1], [0], [0], [1], [0, 0, 1, 1], [], []>} : vector<2x64xf32>, vector<64x192xf32>, vector<2x192xf32> -> vector<2x192xf32>
    %c0_3 = arith.constant 0 : index
    %c0_4 = arith.constant 0 : index
    %3 = vector.load %arg2[%c0_3, %c0_4] : memref<1x192xf32, #tpu.memory_space<vmem>>, vector<1x192xf32>
    %4 = vector.broadcast %3 : vector<1x192xf32> to vector<2x192xf32>
    %5 = arith.addf %2, %4 : vector<2x192xf32>
    %cst_5 = arith.constant 0.000000e+00 : f32
    %6 = vector.broadcast %cst_5 : f32 to vector<2x192xf32>
    %7 = arith.cmpf oge, %5, %6 : vector<2x192xf32>
    %cst_6 = arith.constant 2.000000e-01 : f32
    %8 = vector.broadcast %cst_6 : f32 to vector<2x192xf32>
    %9 = arith.mulf %8, %5 : vector<2x192xf32>
    %10 = arith.select %7, %5, %9 : vector<2x192xi1>, vector<2x192xf32>
    %c0_7 = arith.constant 0 : index
    %c0_8 = arith.constant 0 : index
    %11 = vector.load %arg3[%c0_7, %c0_8] : memref<192x96xf32, #tpu.memory_space<vmem>>, vector<192x96xf32>
    %cst_9 = arith.constant dense<0.000000e+00> : vector<2x96xf32>
    %12 = tpu.matmul %10, %11, %cst_9 {dimension_numbers = #tpu.dot_dimension_numbers<[1], [0], [0], [1], [0, 0, 1, 1], [], []>} : vector<2x192xf32>, vector<192x96xf32>, vector<2x96xf32> -> vector<2x96xf32>
    %c0_10 = arith.constant 0 : index
    %c0_11 = arith.constant 0 : index
    %13 = vector.load %arg4[%c0_10, %c0_11] : memref<1x96xf32, #tpu.memory_space<vmem>>, vector<1x96xf32>
    %14 = vector.broadcast %13 : vector<1x96xf32> to vector<2x96xf32>
    %15 = arith.addf %12, %14 : vector<2x96xf32>
    %cst_12 = arith.constant 0.000000e+00 : f32
    %16 = vector.broadcast %cst_12 : f32 to vector<2x96xf32>
    %17 = arith.cmpf oge, %15, %16 : vector<2x96xf32>
    %cst_13 = arith.constant 2.000000e-01 : f32
    %18 = vector.broadcast %cst_13 : f32 to vector<2x96xf32>
    %19 = arith.mulf %18, %15 : vector<2x96xf32>
    %20 = arith.select %17, %15, %19 : vector<2x96xi1>, vector<2x96xf32>
    %c0_14 = arith.constant 0 : index
    %c0_15 = arith.constant 0 : index
    %21 = vector.load %arg5[%c0_14, %c0_15] : memref<96x24xf32, #tpu.memory_space<vmem>>, vector<96x24xf32>
    %cst_16 = arith.constant dense<0.000000e+00> : vector<2x24xf32>
    %22 = tpu.matmul %20, %21, %cst_16 {dimension_numbers = #tpu.dot_dimension_numbers<[1], [0], [0], [1], [0, 0, 1, 1], [], []>} : vector<2x96xf32>, vector<96x24xf32>, vector<2x24xf32> -> vector<2x24xf32>
    %c0_17 = arith.constant 0 : index
    %c0_18 = arith.constant 0 : index
    %23 = vector.load %arg6[%c0_17, %c0_18] : memref<1x24xf32, #tpu.memory_space<vmem>>, vector<1x24xf32>
    %24 = vector.broadcast %23 : vector<1x24xf32> to vector<2x24xf32>
    %25 = arith.addf %22, %24 : vector<2x24xf32>
    %cst_19 = arith.constant 0.000000e+00 : f32
    %26 = vector.broadcast %cst_19 : f32 to vector<2x24xf32>
    %27 = arith.cmpf oge, %25, %26 : vector<2x24xf32>
    %cst_20 = arith.constant 2.000000e-01 : f32
    %28 = vector.broadcast %cst_20 : f32 to vector<2x24xf32>
    %29 = arith.mulf %28, %25 : vector<2x24xf32>
    %30 = arith.select %27, %25, %29 : vector<2x24xi1>, vector<2x24xf32>
    %31 = arith.mulf %30, %30 : vector<2x24xf32>
    %c0_21 = arith.constant 0 : index
    %c0_22 = arith.constant 0 : index
    %32 = vector.load %arg7[%c0_21, %c0_22] : memref<24x24xf32, #tpu.memory_space<vmem>>, vector<24x24xf32>
    %cst_23 = arith.constant dense<0.000000e+00> : vector<2x24xf32>
    %33 = tpu.matmul %31, %32, %cst_23 {dimension_numbers = #tpu.dot_dimension_numbers<[1], [0], [0], [1], [0, 0, 1, 1], [], []>} : vector<2x24xf32>, vector<24x24xf32>, vector<2x24xf32> -> vector<2x24xf32>
    %34 = math.rsqrt %33 : vector<2x24xf32>
    %35 = arith.mulf %30, %34 : vector<2x24xf32>
    %c0_24 = arith.constant 0 : index
    %c0_25 = arith.constant 0 : index
    %36 = vector.load %arg8[%c0_24, %c0_25] : memref<2x24xf32, #tpu.memory_space<vmem>>, vector<2x24xf32>
    tpu.vector_store %arg8[%c0_24, %c0_25], %35 {strides = array<i32>} : memref<2x24xf32, #tpu.memory_space<vmem>>, vector<2x24xf32>,
    return
  }
}

</mosaic_0001>

<bundles_post_ra>
// kernel: sym_fc_pallas_packed.1
= control target key start
LH: loop header
LB: loop body
LE: loop exit
PB: predicated region body
PF: predicated region fallthrough
CT: control target
= control target key end

     0   :  { %13 = vsyncpa [#allocation3], 0  ;;  %s607_s27 = smov [#allocation2]   ;;  %s803_s0 = inlined_call_operand.vmem [shape: f32[2,64], index: 0, kind: input, shape index: {}]   ;;  %s804_s1 = inlined_call_operand.vmem [shape: f32[64,192], index: 1, kind: input, shape index: {}]   ;;  %s805_s2 = inlined_call_operand.vmem [shape: f32[1,192], index: 2, kind: input, shape index: {}]   ;;  %s806_s3 = inlined_call_operand.hbm [shape: f32[192,96], index: 3, kind: input, shape index: {}]   ;;  %s807_s4 = inlined_call_operand.vmem [shape: f32[1,96], index: 4, kind: input, shape index: {}]   ;;  %s808_s5 = inlined_call_operand.vmem [shape: f32[96,24], index: 5, kind: input, shape index: {}]   ;;  %s809_s6 = inlined_call_operand.vmem [shape: f32[1,24], index: 6, kind: input, shape index: {}]   ;;  %s810_s7 = inlined_call_operand.vmem [shape: f32[24,24], index: 7, kind: input, shape index: {}]   ;;  %s811_s8 = inlined_call_operand.vmem [shape: f32[2,24], index: 8, kind: output, shape index: {}]  }
   0x1   :  { %s25_s28 = sshll.u32 %s607_s27, 4  ;;  %s583_s9 = scalar_lea.hbm %s806_s3, 3072  ;;  %s26_s28 = int_to_ptr.vmem [resolvable:$true] %s25_s28 }
   0x2   :  { %p584_p0 = scmp.ne.s32.totalorder %s806_s3, %s583_s9  ;;  %p587_p1 = scmp.lt.u32.totalorder %s583_s9, %s806_s3 }
   0x4   :  { %p589_p2 = pnand %p587_p1, %p584_p0 }
   0x6   :  { %592 = shalt.err (!%p589_p2)
}
   0x7   :  { %s593_s14 = scalar_lea.vmem %s26_s28, 3072  ;;  %p598_p4 = scmp.lt.s32.totalorder %s26_s28, %s26_s28 }
   0x8   :  { %p594_p3 = scmp.ne.s32.totalorder %s26_s28, %s593_s14  ;;  %p599_p5 = scmp.lt.s32.totalorder %s593_s14, %s593_s14 }
   0xa   :  { %p600_p6 = por %p599_p5, %p598_p4 }
   0xc   :  { %p601_p7 = pnand %p600_p6, %p594_p3 }
   0xe   :  { %604 = shalt.err (!%p601_p7)
}
   0xf   :  { %s608_s15 = smov 128   ;;  %s609_s16 = smov 8  }
  0x10   :  { %31 = dma.hbm_to_vmem [thread:$0]  %s806_s3, 3072, %s26_s28, [#allocation3], %s608_s15, %s608_s15, %s609_s16  }
  0x11   :  { %605 = dma.done.wait [#allocation3], 3072  }
  0x12   :  { %606 = vsyncadd [#allocation3], 4294964224  ;;  %v610_v0 = vmov 0.0   ;;  %v611_v1 = vmov 0.0|0.0   ;;  %v45_v2 = vld [vmem:[%s804_s1 + $0x8] sm:$0xff]  ;;  %v47_v3 = vld [vmem:[%s804_s1 + $0x18] sm:$0xff] }
  0x13   :  { %140 = vmatprep.mubr.f32.mxu0 %v610_v0  ;;  %518 = vmatprep.subr.bf16.mxu1 %v611_v1  ;;  %v44_v4 = vld [vmem:[%s804_s1] sm:$0xff]  ;;  %v502_v5 = vpack.c.bf16 %v47_v3, %v45_v2  ;;  %v46_v6 = vld [vmem:[%s804_s1 + $0x10] sm:$0xff]  ;;  %v49_v7 = vld [vmem:[%s804_s1 + $0x28] sm:$0xff]  ;;  %vm72_vm0 = vcmask 523264   ;;  %vm612_vm3 = vmmov 0   ;;  %vm279_vm5 = vcmask 785408  }
  0x14   :  { %v51_v8 = vld [vmem:[%s804_s1 + $0x38] sm:$0xff]  ;;  %v504_v9 = vpack.c.bf16 %v46_v6, %v44_v4  ;;  %v48_v11 = vld [vmem:[%s804_s1 + $0x20] sm:$0xff]  ;;  %v50_v12 = vld [vmem:[%s804_s1 + $0x30] sm:$0xff]  ;;  %vm360_vm7 = vcmask 195584   ;;  %vm436_vm8 = vcmask 189440  }
  0x15   :  { %v506_v10 = vpack.c.bf16 %v51_v8, %v49_v7  ;;  %v53_v13 = vld [vmem:[%s804_s1 + $0x48] sm:$0xff]  ;;  %503 = vmatprep.subr.bf16.mxu0 %v502_v5  ;;  %v55_v14 = vld [vmem:[%s804_s1 + $0x58] sm:$0xff]  ;;  %v508_v15 = vpack.c.bf16 %v50_v12, %v48_v11  ;;  %v52_v16 = vld [vmem:[%s804_s1 + $0x40] sm:$0xff] }
  0x16   :  { %505 = vmatpush1.bf16.msra.mxu0 %v504_v9  ;;  %v54_v17 = vld [vmem:[%s804_s1 + $0x50] sm:$0xff]  ;;  %v510_v18 = vpack.c.bf16 %v55_v14, %v53_v13  ;;  %v57_v19 = vld [vmem:[%s804_s1 + $0x68] sm:$0xff]  ;;  %v59_v20 = vld [vmem:[%s804_s1 + $0x78] sm:$0xff] }
  0x17   :  { %507 = vmatprep.subr.bf16.mxu0 %v506_v10  ;;  %v153_v21 = vld [vmem:[#allocation2] sm:$0xff]  ;;  %v154_v22 = vld [vmem:[#allocation2 + $0x8] sm:$0xff]  ;;  %v155_v23 = vld [vmem:[#allocation2 + $0x10] sm:$0xff]  ;;  %v512_v26 = vpack.c.bf16 %v54_v17, %v52_v16  ;;  %v514_v27 = vpack.c.bf16 %v59_v20, %v57_v19  ;;  %v62_v16 = vlaneseq }
  0x18   :  { %v156_v24 = vld [vmem:[#allocation2 + $0x18] sm:$0xff]  ;;  %v519_v25 = vpack.c.bf16 %v154_v22, %v153_v21  ;;  %v56_v28 = vld [vmem:[%s804_s1 + $0x60] sm:$0xff]  ;;  %v58_v29 = vld [vmem:[%s804_s1 + $0x70] sm:$0xff] }
  0x19   :  { %v522_v30 = vpack.c.bf16 %v156_v24, %v155_v23  ;;  %v157_v31 = vld [vmem:[#allocation2 + $0x20] sm:$0xff]  ;;  %v158_v32 = vld [vmem:[#allocation2 + $0x28] sm:$0xff]  ;;  %v516_v33 = vpack.c.bf16 %v58_v29, %v56_v28  ;;  %v159_v35 = vld [vmem:[#allocation2 + $0x30] sm:$0xff]  ;;  %v63_v17 = vshrl.u32 %v62_v16, 7 }
  0x1a   :  { %509 = vmatpush1.bf16.msra.mxu0 %v508_v15  ;;  %520 = vmatpush1.bf16.msra.mxu1 %v519_v25  ;;  %v525_v34 = vpack.c.bf16 %v158_v32, %v157_v31  ;;  %v160_v36 = vld [vmem:[#allocation2 + $0x38] sm:$0xff]  ;;  %v43_v37 = vld [vmem:[%s803_s0] sm:$0x3]  ;;  %v162_v40 = vld [vmem:[#allocation2 + $0x48] sm:$0xff] }
  0x1b   :  { %511 = vmatprep.subr.bf16.mxu0 %v510_v18  ;;  %521 = vmatprep.subr.bf16.mxu1 %v611_v1  ;;  %v528_v38 = vpack.c.bf16 %v160_v36, %v159_v35  ;;  %v161_v39 = vld [vmem:[#allocation2 + $0x40] sm:$0xff]  ;;  %v163_v42 = vld [vmem:[#allocation2 + $0x50] sm:$0xff]  ;;  %v164_v43 = vld [vmem:[#allocation2 + $0x58] sm:$0xff]  ;;  %v64_v18 = vsub.s32 0, %v63_v17  ;;  %v68_v20 = vsub.s32 1, %v63_v17 }
  0x1c   :  { %v531_v41 = vpack.c.bf16 %v162_v40, %v161_v39  ;;  %v534_v44 = vpack.c.bf16 %v164_v43, %v163_v42  ;;  %v165_v45 = vld [vmem:[#allocation2 + $0x60] sm:$0xff]  ;;  %v166_v46 = vld [vmem:[#allocation2 + $0x68] sm:$0xff]  ;;  %v167_v48 = vld [vmem:[#allocation2 + $0x70] sm:$0xff] }
  0x1d   :  { %v537_v47 = vpack.c.bf16 %v166_v46, %v165_v45  ;;  %v168_v49 = vld [vmem:[#allocation2 + $0x78] sm:$0xff]  ;;  %v169_v51 = vld [vmem:[#allocation2 + $0x80] sm:$0xff]  ;;  %v170_v52 = vld [vmem:[#allocation2 + $0x88] sm:$0xff] }
  0x1e   :  { %513 = vmatpush1.bf16.msra.mxu0 %v512_v26  ;;  %523 = vmatpush1.bf16.msra.mxu1 %v522_v30  ;;  %v540_v50 = vpack.c.bf16 %v168_v49, %v167_v48  ;;  %v543_v53 = vpack.c.bf16 %v170_v52, %v169_v51  ;;  %v171_v54 = vld [vmem:[#allocation2 + $0x90] sm:$0xff]  ;;  %v172_v55 = vld [vmem:[#allocation2 + $0x98] sm:$0xff]  ;;  %v173_v57 = vld [vmem:[#allocation2 + $0xa0] sm:$0xff] }
  0x1f   :  { %515 = vmatprep.subr.bf16.mxu0 %v514_v27  ;;  %524 = vmatprep.subr.bf16.mxu1 %v611_v1  ;;  %v546_v56 = vpack.c.bf16 %v172_v55, %v171_v54  ;;  %v174_v58 = vld [vmem:[#allocation2 + $0xa8] sm:$0xff]  ;;  %v175_v60 = vld [vmem:[#allocation2 + $0xb0] sm:$0xff]  ;;  %v176_v61 = vld [vmem:[#allocation2 + $0xb8] sm:$0xff] }
  0x20   :  { %v549_v59 = vpack.c.bf16 %v174_v58, %v173_v57  ;;  %v552_v62 = vpack.c.bf16 %v176_v61, %v175_v60  ;;  %v260_v63 = vld [vmem:[%s808_s5] sm:$0xff]  ;;  %v261_v2 = vld [vmem:[%s808_s5 + $0x8] sm:$0xff]  ;;  %v262_v3 = vld [vmem:[%s808_s5 + $0x10] sm:$0xff] }
  0x21   :  { %v555_v4 = vpack.c.bf16 %v261_v2, %v260_v63  ;;  %v263_v5 = vld [vmem:[%s808_s5 + $0x18] sm:$0xff]  ;;  %v264_v7 = vld [vmem:[%s808_s5 + $0x20] sm:$0xff]  ;;  %v265_v8 = vld [vmem:[%s808_s5 + $0x28] sm:$0xff] }
  0x22   :  { %517 = vmatpush1.bf16.msra.mxu0 %v516_v33  ;;  %526 = vmatpush1.bf16.msra.mxu1 %v525_v34  ;;  %v558_v6 = vpack.c.bf16 %v263_v5, %v262_v3  ;;  %v561_v9 = vpack.c.bf16 %v265_v8, %v264_v7  ;;  %v266_v10 = vld [vmem:[%s808_s5 + $0x30] sm:$0xff]  ;;  %v267_v11 = vld [vmem:[%s808_s5 + $0x38] sm:$0xff]  ;;  %v268_v13 = vld [vmem:[%s808_s5 + $0x40] sm:$0xff] }
  0x23   :  { %554 = vmatprep.subr.bf16.mxu0 %v611_v1  ;;  %527 = vmatprep.subr.bf16.mxu1 %v611_v1  ;;  %v564_v12 = vpack.c.bf16 %v267_v11, %v266_v10  ;;  %v269_v14 = vld [vmem:[%s808_s5 + $0x48] sm:$0xff]  ;;  %v60_v19 = vld [vmem:[%s805_s2] sm:$0x3]  ;;  %v270_v31 = vld [vmem:[%s808_s5 + $0x50] sm:$0xff] }
  0x24   :  { %v567_v15 = vpack.c.bf16 %v269_v14, %v268_v13  ;;  %v65_v21 = vrot.slane %v60_v19, %v64_v18  ;;  %v69_v22 = vrot.slane %v60_v19, %v68_v20  ;;  %v271_v32 = vld [vmem:[%s808_s5 + $0x58] sm:$0xff]  ;;  %v444_v34 = vld [vmem:[%s807_s4] ss:$0 sm:$0xff]  ;;  %v358_v40 = vld [vmem:[%s810_s7 + $0x8] sm:$0xff] }
  0x25   :  { %443 = vmatmul.mubr.msk.f32.vlgmr.msra.gmra.mrb[0].mxu0 %vm72_vm0, %v43_v37  ;;  %v570_v33 = vpack.c.bf16 %v271_v32, %v270_v31  ;;  %v359_v42 = vld [vmem:[%s810_s7 + $0x10] sm:$0xff]  ;;  %v446_v43 = vld [vmem:[%s809_s6] ss:$0 sm:$0xff] }
  0x26   :  { %529 = vmatpush1.bf16.msra.mxu1 %v528_v38  ;;  %556 = vmatpush3.bf16.msra.mxu0 %v555_v4 }
  0x27   :  { %530 = vmatprep.subr.bf16.mxu1 %v611_v1  ;;  %557 = vmatprep.subr.bf16.mxu0 %v611_v1 }
  0x28   :  { %490 = vmatprep.mubr.msk.f32.mxu0 %vm612_vm3, %v610_v0 }
  0x2a   :  { %532 = vmatpush1.bf16.msra.mxu1 %v531_v41  ;;  %559 = vmatpush3.bf16.msra.mxu0 %v558_v6 }
  0x2b   :  { %533 = vmatprep.subr.bf16.mxu1 %v611_v1  ;;  %560 = vmatprep.subr.bf16.mxu0 %v611_v1 }
  0x2e   :  { %535 = vmatpush1.bf16.msra.mxu1 %v534_v44  ;;  %562 = vmatpush3.bf16.msra.mxu0 %v561_v9 }
  0x2f   :  { %536 = vmatprep.subr.bf16.mxu1 %v611_v1  ;;  %563 = vmatprep.subr.bf16.mxu0 %v611_v1 }
  0x32   :  { %538 = vmatpush1.bf16.msra.mxu1 %v537_v47  ;;  %565 = vmatpush3.bf16.msra.mxu0 %v564_v12 }
  0x33   :  { %539 = vmatprep.subr.bf16.mxu1 %v611_v1  ;;  %566 = vmatprep.subr.bf16.mxu0 %v611_v1 }
  0x36   :  { %541 = vmatpush1.bf16.msra.mxu1 %v540_v50  ;;  %568 = vmatpush3.bf16.msra.mxu0 %v567_v15 }
  0x37   :  { %542 = vmatprep.subr.bf16.mxu1 %v611_v1  ;;  %569 = vmatprep.subr.bf16.mxu0 %v611_v1 }
  0x3a   :  { %544 = vmatpush1.bf16.msra.mxu1 %v543_v53  ;;  %571 = vmatpush3.bf16.msra.mxu0 %v570_v33 }
  0x3b   :  { %545 = vmatprep.subr.bf16.mxu1 %v611_v1  ;;  %572 = vmatprep.subr.bf16.mxu0 %v611_v1 }
  0x3e   :  { %547 = vmatpush1.bf16.msra.mxu1 %v546_v56 }
  0x3f   :  { %548 = vmatprep.subr.bf16.mxu1 %v611_v1 }
  0x42   :  { %550 = vmatpush1.bf16.msra.mxu1 %v549_v59 }
  0x43   :  { %551 = vmatprep.subr.bf16.mxu1 %v611_v1  ;;  %v357_v1 = vld [vmem:[%s810_s7] sm:$0xff] }
  0x44   :  { %v573_v41 = vpack.c.bf16 %v358_v40, %v357_v1 }
  0x46   :  { %553 = vmatpush1.bf16.msra.mxu1 %v552_v62 }
  0xf8   :  { %v142_v23 = vpop.f32.mrb[0].mxu0 }
  0xf9   :  { %v143_v24 = vadd.f32 %v142_v23, %v65_v21  ;;  %v144_v25 = vpop.f32.mrb[1].mxu0 }
  0xfa   :  { %v145_v26 = vadd.f32 %v144_v25, %v69_v22 }
  0xfb   :  { %v149_v27 = vmul.f32 0.2, %v143_v24  ;;  %vm147_vm2 = vcmp.ge.f32.partialorder %v143_v24, 0.0 }
  0xfc   :  { %vm148_vm1 = vcmp.ge.f32.partialorder %v145_v26, 0.0  ;;  %v150_v28 = vmul.f32 0.2, %v145_v26 }
  0xfd   :  { %v151_v30 = vsel %vm147_vm2, %v143_v24, %v149_v27 }
  0xfe   :  { %v152_v29 = vsel %vm148_vm1, %v145_v26, %v150_v28 }
  0xff   :  { %445 = vmatprep.mubr.msk.f32.mxu1 %vm72_vm0, %v152_v29 }
 0x100   :  { %252 = vmatmul.mubr.f32.vlgmr.msra.gmra.mrb[0].mxu1 %v151_v30 }
 0x1d3   :  { %v253_v35 = vpop.f32.mrb[0].mxu1 }
 0x1d4   :  { %v254_v36 = vadd.f32 %v444_v34, %v253_v35  ;;  %v255_v37 = vpop.f32.mrb[1].mxu1 }
 0x1d6   :  { %vm257_vm4 = vcmp.ge.f32.partialorder %v254_v36, 0.0  ;;  %v258_v38 = vmul.f32 0.2, %v254_v36 }
 0x1d8   :  { %v259_v39 = vsel %vm257_vm4, %v254_v36, %v258_v38 }
 0x1d9   :  { %491 = vmatmul.mubr.msk.f32.vlgmr.msra.gmra.mrb[2].mxu0 %vm279_vm5, %v259_v39 }
 0x1da   :  { %499 = vmatprep.mubr.msk.f32.mxu0 %vm612_vm3, %v610_v0  ;;  %574 = vmatpush3.bf16.msra.mxu0 %v573_v41 }
 0x1db   :  { %497 = vmatprep.subr.mxu0 %v610_v0 }
 0x1de   :  { %498 = vmatpush3.msra.mxu0 %v359_v42 }
 0x2ac   :  { %v349_v44 = vpop.f32.mrb[2].mxu0 }
 0x2ad   :  { %v350_v45 = vadd.f32 %v446_v43, %v349_v44  ;;  %v492_v46 = vpop.f32.mrb[3].mxu0 }
 0x2af   :  { %vm353_vm6 = vcmp.ge.f32.partialorder %v350_v45, 0.0  ;;  %v354_v47 = vmul.f32 0.2, %v350_v45 }
 0x2b1   :  { %v355_v48 = vsel %vm353_vm6, %v350_v45, %v354_v47 }
 0x2b2   :  { %v356_v49 = vmul.f32 %v355_v48, %v355_v48 }
 0x2b4   :  { %500 = vmatmul.mubr.msk.f32.vlgmr.msra.gmra.mrb[4].mxu0 %vm360_vm7, %v356_v49 }
 0x387   :  { %v430_v50 = vpop.f32.mrb[4].mxu0 }
 0x388   :  { %581 = vrsqrt.f32 %v430_v50  ;;  %v501_v0 = vpop.f32.mrb[5].mxu0 }
 0x392   :  { %v582_v51 = vpop.eup %581 }
 0x393   :  { %v435_v52 = vmul.f32 %v582_v51, %v355_v48 }
 0x395   :  { %437 = vst.msk [vmem:[%s811_s8] sm:$0x3] %vm436_vm8, %v435_v52 }
 0x396   :  { %442 = vsyncpa [#allocation3], 1 }

</bundles_post_ra>
